<compile_context>
chip_gen: v7x
topology: tpu7x:2x2x1
jax: 0.10.0
libtpu: 0.0.40
codegen_flags: <defaults>
</compile_context>

<pallas_src>
import functools

import jax
import jax.numpy as jnp
from jax.experimental import pallas as pl
from jax.experimental.pallas import tpu as pltpu


# ---------------------------------------------------------------------------
# Deterministic parameter construction (synthetic, mirrors AMK.__init__).
# ---------------------------------------------------------------------------
def hyperbolic_cross_design_points(deg: int, input_lb: float, input_ub: float):
    """Dyadic design points on [lb, ub], sorted level-by-level (dyadic_sort=True)."""
    pts = []
    for level in range(1, deg + 1):
        denom = 2 ** level
        for j in range(1, denom, 2):
            pts.append(j / denom)
    pts = jnp.asarray(pts, dtype=jnp.float32)
    return input_lb + (input_ub - input_lb) * pts  # shape (2**deg - 1,)


def mk_chol_inv(points: jnp.ndarray, lengthscale: float = 1.0) -> jnp.ndarray:
    """R^{-1} where K(design, design) = R^T R, R upper triangular (Laplace kernel)."""
    diff = jnp.abs(points[:, None] - points[None, :])
    K = jnp.exp(-diff / lengthscale)
    L = jnp.linalg.cholesky(K)                     # lower, K = L L^T
    R = L.T                                        # upper, K = R^T R
    eye = jnp.eye(points.shape[0], dtype=K.dtype)
    Rinv = jax.scipy.linalg.solve_triangular(R, eye, lower=False)
    return Rinv


# ---------------------------------------------------------------------------
# Pallas kernel: lane-dense Laplace features + one full-width MXU pass.
# ---------------------------------------------------------------------------
def amk_kernel(x_ref, pts_ref, b_ref, out_ref, *, inv_ls, n_rep):
    # x_ref:   (TRg, G)     G=16 original rows packed on the lane axis
    # pts_ref: (1, 128)     design point m at lane m*G + j   (feature-major)
    # b_ref:   (128, 128)   B[m*G+j, j*Mp+n] = rinv[m, n]    (block matmul + lane permutation)
    # out_ref: (TRg, 128)   lane j*Mp + n = feature n of packed row j (row-major)
    x = x_ref[...]                                       # (TRg, 16)
    x_t = jnp.tile(x, (1, n_rep))                        # (TRg, 128): lane m*G+j -> x[:, j]
    k = jnp.exp(-jnp.abs(x_t - pts_ref[...]) * inv_ls)   # (TRg, 128) Laplace features, full lanes
    out = jnp.dot(k, b_ref[...],
                  preferred_element_type=jnp.float32)    # (TRg, 128) single full-width MXU pass
    out_ref[...] = out.astype(out_ref.dtype)             # unmasked, lane-dense store


def amk_forward(x, design_points, chol_inv, lengthscale=1.0, max_tile_rows=4096):
    """Pallas implementation of AMK.forward.  Returns (N, D*M) float32."""
    N = x.shape[0]
    xf = jnp.reshape(x, (N, -1)).astype(jnp.float32)   # torch.flatten(x, start_dim=1)
    D = xf.shape[1]
    M = design_points.shape[0]

    Mp = ((M + 7) // 8) * 8            # features padded to 8
    G = 128 // Mp                      # original rows packed per 128-lane row (16)
    L = G * Mp                         # 128 lanes

    R = N * D                          # total (batch, feature) rows
    Rg = pl.cdiv(R, G)                 # packed rows

    # Tile: large enough to amortize per-step pipeline overhead (~2 MiB output per
    # buffer), small enough for VMEM on all generations (incl. v7x 64 MiB), and
    # >= 2 grid steps whenever possible so both v7x TensorCores get work.
    tile = min(max_tile_rows, pl.cdiv(Rg, 2))
    tile = max(8, ((tile + 7) // 8) * 8)
    grid = (pl.cdiv(Rg, tile),)
    Rg_p = grid[0] * tile

    # Pack x lane-dense: original row r = g*G + j  ->  xg[g, j]; zero-pad only if needed.
    total = Rg_p * G
    x_flat = xf.reshape(-1)
    if total != R:
        x_flat = jnp.zeros((total,), jnp.float32).at[:R].set(x_flat)
    xg = x_flat.reshape(Rg_p, G)

    # Design points, feature-major on the lane axis: lane m*G + j -> p_pad[m].
    p_pad = jnp.zeros((Mp,), jnp.float32).at[:M].set(
        design_points.reshape(-1).astype(jnp.float32))
    pts_exp = jnp.repeat(p_pad, G).reshape(1, L)

    # B[m*G+j, j'*Mp+n] = rinv[m, n] * delta(j, j'): one 128x128 operand that applies
    # the 8x8 chol_inv to all 16 packed rows at once and permutes the result lanes
    # from feature-major to row-major.  Pad rows/cols of rinv are zero, so the pad
    # feature and pad output column contribute nothing.
    rinv_p = jnp.zeros((Mp, Mp), jnp.float32).at[:M, :M].set(chol_inv.astype(jnp.float32))
    B = jnp.einsum('mn,jk->mjkn', rinv_p, jnp.eye(G, dtype=jnp.float32)).reshape(L, L)

    kernel = functools.partial(amk_kernel, inv_ls=1.0 / lengthscale, n_rep=Mp)

    out = pl.pallas_call(
        kernel,
        out_shape=jax.ShapeDtypeStruct((Rg_p, L), jnp.float32),
        grid_spec=pltpu.PrefetchScalarGridSpec(
            num_scalar_prefetch=0,
            grid=grid,
            in_specs=[
                pl.BlockSpec((tile, G), lambda i: (i, 0)),   # packed x rows, tiled
                pl.BlockSpec((1, L), lambda i: (0, 0)),      # design points (constant block)
                pl.BlockSpec((L, L), lambda i: (0, 0)),      # block-diag rinv (constant block)
            ],
            out_specs=pl.BlockSpec((tile, L), lambda i: (i, 0)),
        ),
        compiler_params=pltpu.CompilerParams(
            dimension_semantics=("parallel",)),
    )(xg, pts_exp, B)

    # (Rg_p, 128) -> (Rg_p*16, 8) is a free row-major reshape; strip pad rows/column.
    out = out.reshape(Rg_p * G, Mp)[:R, :M].reshape(N, D * M)
    return out


# ---------------------------------------------------------------------------
# Pure-JAX reference (mirrors the PyTorch forward).
# ---------------------------------------------------------------------------
def amk_reference(x, design_points, chol_inv, lengthscale=1.0):
    N = x.shape[0]
    xf = jnp.reshape(x, (N, -1)).astype(jnp.float32)[..., None]          # (N, D, 1)
    K = jnp.exp(-jnp.abs(xf - design_points.reshape(-1)) / lengthscale)  # (N, D, M)
    out = K @ chol_inv                                                   # (N, D, M)
    return out.reshape(N, -1)


if __name__ == "__main__":
    # Module config: in_features implied by flattened input, n_level=3, [-2, 2].
    n_level = 3
    lengthscale = 1.0
    design_points = hyperbolic_cross_design_points(n_level, -2.0, 2.0)   # (7,)
    chol_inv = mk_chol_inv(design_points, lengthscale)                   # (7, 7)

    # Small deterministic input (NCHW, flattened by the forward pass).
    key = jax.random.PRNGKey(0)
    x = jax.random.normal(key, (2, 4, 16, 16), dtype=jnp.float32)

    out = amk_forward(x, design_points, chol_inv, lengthscale)
    out = jax.block_until_ready(out)

    ref = amk_reference(x, design_points, chol_inv, lengthscale)
    assert out.shape == (2, 4 * 16 * 16 * design_points.shape[0]), out.shape
    assert jnp.allclose(out, ref, atol=1e-5, rtol=1e-5), (
        float(jnp.max(jnp.abs(out - ref))))

    print("KERNEL_OK")
</pallas_src>

<mosaic_0001>
module attributes {stable_mosaic.version = 11 : i64} {
  func.func @amk_kernel(%arg0: i32, %arg1: memref<64x16xf32, #tpu.memory_space<vmem>>, %arg2: memref<1x128xf32, #tpu.memory_space<vmem>>, %arg3: memref<128x128xf32, #tpu.memory_space<vmem>>, %arg4: memref<64x128xf32, #tpu.memory_space<vmem>>) attributes {dimension_semantics = [#tpu.dimension_semantics<parallel>], iteration_bounds = array<i64: 2>, scalar_prefetch = 0 : i64, scratch_operands = 0 : i64, tpu.core_type = #tpu.core_type<tc>, window_params = [{transform_indices = @transform_0, window_bounds = array<i64: 64, 16>}, {pipeline_mode = #tpu.pipeline_mode<synchronous>, transform_indices = @transform_1, window_bounds = array<i64: 1, 128>}, {pipeline_mode = #tpu.pipeline_mode<synchronous>, transform_indices = @transform_2, window_bounds = array<i64: 128, 128>}, {transform_indices = @transform_3, window_bounds = array<i64: 64, 128>}]} {
    %c0 = arith.constant 0 : index
    %c0_0 = arith.constant 0 : index
    %0 = vector.load %arg1[%c0, %c0_0] : memref<64x16xf32, #tpu.memory_space<vmem>>, vector<64x16xf32>
    %1 = tpu.concatenate %0, %0, %0, %0, %0, %0, %0, %0 in 1 : vector<64x16xf32>, vector<64x16xf32>, vector<64x16xf32>, vector<64x16xf32>, vector<64x16xf32>, vector<64x16xf32>, vector<64x16xf32>, vector<64x16xf32> -> vector<64x128xf32>
    %c0_1 = arith.constant 0 : index
    %c0_2 = arith.constant 0 : index
    %2 = vector.load %arg2[%c0_1, %c0_2] : memref<1x128xf32, #tpu.memory_space<vmem>>, vector<1x128xf32>
    %3 = vector.broadcast %2 : vector<1x128xf32> to vector<64x128xf32>
    %4 = arith.subf %1, %3 : vector<64x128xf32>
    %5 = math.absf %4 : vector<64x128xf32>
    %cst = arith.constant 0.000000e+00 : f32
    %6 = vector.broadcast %cst : f32 to vector<64x128xf32>
    %7 = arith.subf %6, %5 : vector<64x128xf32>
    %cst_3 = arith.constant 1.000000e+00 : f32
    %8 = vector.broadcast %cst_3 : f32 to vector<64x128xf32>
    %9 = arith.mulf %7, %8 : vector<64x128xf32>
    %10 = math.exp %9 : vector<64x128xf32>
    %c0_4 = arith.constant 0 : index
    %c0_5 = arith.constant 0 : index
    %11 = vector.load %arg3[%c0_4, %c0_5] : memref<128x128xf32, #tpu.memory_space<vmem>>, vector<128x128xf32>
    %cst_6 = arith.constant dense<0.000000e+00> : vector<64x128xf32>
    %12 = tpu.matmul %10, %11, %cst_6 {dimension_numbers = #tpu.dot_dimension_numbers<[1], [0], [0], [1], [0, 0, 1, 1], [], []>} : vector<64x128xf32>, vector<128x128xf32>, vector<64x128xf32> -> vector<64x128xf32>
    %c0_7 = arith.constant 0 : index
    %c0_8 = arith.constant 0 : index
    %13 = vector.load %arg4[%c0_7, %c0_8] : memref<64x128xf32, #tpu.memory_space<vmem>>, vector<64x128xf32>
    tpu.vector_store %arg4[%c0_7, %c0_8], %12 {strides = array<i32>} : memref<64x128xf32, #tpu.memory_space<vmem>>, vector<64x128xf32>,
    return
  }
  func.func @transform_0(%arg0: i32) -> (i32, i32) {
    %c0_i32 = arith.constant 0 : i32
    %c0_i32_0 = arith.constant 0 : i32
    return %arg0, %c0_i32 : i32, i32
  }
  func.func @transform_1(%arg0: i32) -> (i32, i32) {
    %c0_i32 = arith.constant 0 : i32
    %c0_i32_0 = arith.constant 0 : i32
    %c0_i32_1 = arith.constant 0 : i32
    return %c0_i32, %c0_i32_0 : i32, i32
  }
  func.func @transform_2(%arg0: i32) -> (i32, i32) {
    %c0_i32 = arith.constant 0 : i32
    %c0_i32_0 = arith.constant 0 : i32
    %c0_i32_1 = arith.constant 0 : i32
    return %c0_i32, %c0_i32_0 : i32, i32
  }
  func.func @transform_3(%arg0: i32) -> (i32, i32) {
    %c0_i32 = arith.constant 0 : i32
    %c0_i32_0 = arith.constant 0 : i32
    return %arg0, %c0_i32 : i32, i32
  }
}

</mosaic_0001>

<bundles_post_ra>
// kernel: tpu_custom_call.1
= control target key start
LH: loop header
LB: loop body
LE: loop exit
PB: predicated region body
PF: predicated region fallthrough
CT: control target
= control target key end

     0   :  { %8 = vsyncpa [#allocation3], 0  ;;  %s1366_s0 = inlined_call_operand.vmem [shape: f32[128,16], index: 0, kind: input, shape index: {}]   ;;  %s1367_s1 = inlined_call_operand.vmem [shape: f32[1,128], index: 1, kind: input, shape index: {}]   ;;  %s1368_s2 = inlined_call_operand.vmem [shape: f32[128,128], index: 2, kind: input, shape index: {}]   ;;  %s1369_s3 = inlined_call_operand.hbm [shape: f32[128,128], index: 3, kind: output, shape index: {}]  }
   0x1   :  { %10 = vsyncpa [#allocation3 + $0x1], 0  ;;  %s959_s12 = smov 0   ;;  %s961_s13 = smov 0  }
   0x2   :  { %s963_s14 = smov 0   ;;  %s965_s15 = smov 0  }
   0x3 LB: > { %s980_s16 = sadd.s32 4294967295, %s927_s15   ;;  %s671_s17 = sadd.s32 4294967294, %s927_s15   ;;  %s927_s15 = sphi %s965_s15, %s1375_s15   ;;  %s923_s14 = sphi %s963_s14, %s1374_s14   ;;  %s919_s13 = sphi %s961_s13, %s1373_s13   ;;  %s915_s12 = sphi %s959_s12, %s1372_s12  }
   0x4   : > { %s984_s18 = sadd.s32 1, %s927_s15   ;;  %s91_s19 = sadd.s32 1, %s923_s14 }
   0x5   : > { %s88_s20 = ssub.s32 %s927_s15, %s984_s18  ;;  %p101_p0 = scmp.ne.s32.totalorder %s923_s14, %s919_s13 }
   0x6   : > { %p89_p1 = scmp.eq.s32.totalorder %s88_s20, 0  ;;  %p102_p2 = scmp.eq.s32.totalorder %s980_s16, 1 }
   0x7   : > { %p107_p3 = scmp.ne.s32.totalorder %s919_s13, %s915_s12  ;;  %p108_p4 = scmp.eq.s32.totalorder %s671_s17, 1 }
   0x8   : > { %s995_s21 = scalar_select %p89_p1, %s923_s14, %s91_s19  }
   0x9   : > { %p997_p5 = por %p102_p2, %p101_p0  ;;  %p1001_p6 = por %p108_p4, %p107_p3 }
   0xa   : > { %p674_p7 = scmp.ge.s32.totalorder %s927_s15, 1  ;;  %p141_p8 = scmp.lt.s32.totalorder %s927_s15, 3 }
   0xc   : > { %p142_p9 = pnand %p674_p7, %p141_p8 }
   0xd   : > { %s676_s24 = sshll.u32 (!%p142_p9), %s980_s16, 3  ;;  %s929_s29 = smov (!%p142_p9), 16   ;;  %v466_v8 = vld [vmem:[%s1368_s2] sm:$0xff] (!%p142_p9)  ;;  %v467_v9 = vld [vmem:[%s1368_s2 + $0x8] sm:$0xff] (!%p142_p9)  ;;  %v468_v11 = vld [vmem:[%s1368_s2 + $0x10] sm:$0xff] (!%p142_p9)  ;;  %vm356_vm0 = vcmask (!%p142_p9), 130048  }
   0xe   : > { %145 = sbr.rel (%p142_p9) target bundleno = 497 (0x1f1), region = 32  ;;  %p166_p10 = scmp.lt.s32.totalorder (!%p142_p9), %s676_s24, 15  ;;  %v753_v10 = vpack.c.bf16 (!%p142_p9), %v467_v9, %v466_v8  ;;  %v469_v12 = vld [vmem:[%s1368_s2 + $0x18] sm:$0xff] (!%p142_p9)  ;;  %v470_v14 = vld [vmem:[%s1368_s2 + $0x20] sm:$0xff] (!%p142_p9)  ;;  %v471_v15 = vld [vmem:[%s1368_s2 + $0x28] sm:$0xff] (!%p142_p9)  ;;  %vm365_vm1 = vcmask (!%p142_p9), 261120  }
   0xf   : > { %s930_s30 = smov (!%p142_p9), 32   ;;  %s931_s4 = smov (!%p142_p9), 48   ;;  %v757_v13 = vpack.c.bf16 (!%p142_p9), %v469_v12, %v468_v11  ;;  %v761_v16 = vpack.c.bf16 (!%p142_p9), %v471_v15, %v470_v14  ;;  %v472_v17 = vld [vmem:[%s1368_s2 + $0x30] sm:$0xff] (!%p142_p9)  ;;  %v473_v18 = vld [vmem:[%s1368_s2 + $0x38] sm:$0xff] (!%p142_p9)  ;;  %v474_v20 = vld [vmem:[%s1368_s2 + $0x40] sm:$0xff] (!%p142_p9)  ;;  %vm374_vm2 = vcmask (!%p142_p9), 392192  }
  0x10   : > { %s932_s5 = smov (!%p142_p9), 64   ;;  %s933_s6 = smov (!%p142_p9), 80   ;;  %754 = vmatprep.subr.bf16.mxu0 (!%p142_p9), %v753_v10  ;;  %785 = vmatprep.subr.bf16.mxu1 (!%p142_p9), %v753_v10  ;;  %v765_v19 = vpack.c.bf16 (!%p142_p9), %v473_v18, %v472_v17  ;;  %v475_v21 = vld [vmem:[%s1368_s2 + $0x48] sm:$0xff] (!%p142_p9)  ;;  %v476_v23 = vld [vmem:[%s1368_s2 + $0x50] sm:$0xff] (!%p142_p9)  ;;  %v477_v24 = vld [vmem:[%s1368_s2 + $0x58] sm:$0xff] (!%p142_p9)  ;;  %vm383_vm3 = vcmask (!%p142_p9), 523264  }
  0x11   : > { %s934_s7 = smov (!%p142_p9), 96   ;;  %756 = vmatpush3.bf16.msra.mxu0 (!%p142_p9), %v753_v10  ;;  %793 = vmatpush3.bf16.msra.mxu1 (!%p142_p9), %v753_v10  ;;  %s935_s10 = smov (!%p142_p9), 112   ;;  %v769_v22 = vpack.c.bf16 (!%p142_p9), %v475_v21, %v474_v20  ;;  %v773_v25 = vpack.c.bf16 (!%p142_p9), %v477_v24, %v476_v23  ;;  %v478_v26 = vld [vmem:[%s1368_s2 + $0x60] sm:$0xff] (!%p142_p9)  ;;  %v479_v27 = vld [vmem:[%s1368_s2 + $0x68] sm:$0xff] (!%p142_p9)  ;;  %v480_v29 = vld [vmem:[%s1368_s2 + $0x70] sm:$0xff] (!%p142_p9)  ;;  %vm392_vm4 = vcmask (!%p142_p9), 654336  }
  0x12   : > { %758 = vmatprep.subr.bf16.mxu0 (!%p142_p9), %v757_v13  ;;  %786 = vmatprep.subr.bf16.mxu1 (!%p142_p9), %v757_v13  ;;  %v777_v28 = vpack.c.bf16 (!%p142_p9), %v479_v27, %v478_v26  ;;  %v481_v30 = vld [vmem:[%s1368_s2 + $0x78] sm:$0xff] (!%p142_p9)  ;;  %vm401_vm5 = vcmask (!%p142_p9), 785408   ;;  %vm410_vm6 = vcmask (!%p142_p9), 916480  }
  0x13   : > { %v781_v31 = vpack.c.bf16 (!%p142_p9), %v481_v30, %v480_v29 }
  0x15   : > { %s1377_s24 = smov (!%p166_p10, %s676_s24), 15  ;;  %760 = vmatpush3.bf16.msra.mxu0 %v757_v13  ;;  %794 = vmatpush3.bf16.msra.mxu1 %v757_v13 }
  0x16   : > { %s677_s25 = sshll.u32 %s1377_s24, 3  ;;  %762 = vmatprep.subr.bf16.mxu0 %v761_v16  ;;  %787 = vmatprep.subr.bf16.mxu1 %v761_v16  ;;  %s684_s24 = sshll.u32 %s980_s16, 10 }
  0x17   : > { %s1011_s28 = scalar_lea.vmem %s1366_s0, %s677_s25  ;;  %s1323_s27 = scalar_lea.hbm %s1369_s3, %s684_s24 }
  0x18   : > { %v1014_v0 = vld [vmem:[%s1011_s28 + $0x8] sm:$0xff]  ;;  %v1017_v1 = vld [vmem:[%s1011_s28] sm:$0xff]  ;;  %v1054_v4 = vld [vmem:[%s1011_s28 + $0x30] sm:$0xff] }
  0x19   : > { %190 = vrot.lane.b32.xlu1 %v1014_v0, %s929_s29  ;;  %188 = vrot.lane.b32.xlu0 %v1017_v1, %s929_s29  ;;  %v1024_v2 = vld [vmem:[%s1011_s28 + $0x28] sm:$0xff]  ;;  %v1027_v3 = vld [vmem:[%s1011_s28 + $0x20] sm:$0xff] }
  0x1a   : > { %v1057_v5 = vld [vmem:[%s1011_s28 + $0x10] sm:$0xff]  ;;  %v1072_v6 = vld [vmem:[%s1011_s28 + $0x38] sm:$0xff]  ;;  %764 = vmatpush3.bf16.msra.mxu0 %v761_v16  ;;  %795 = vmatpush3.bf16.msra.mxu1 %v761_v16 }
  0x1b   : > { %v1075_v7 = vld [vmem:[%s1011_s28 + $0x18] sm:$0xff]  ;;  %766 = vmatprep.subr.bf16.mxu0 %v765_v19  ;;  %788 = vmatprep.subr.bf16.mxu1 %v765_v19  ;;  %s936_s28 = smov [#allocation2]  }
  0x1d   : > { %198 = vrot.lane.b32.xlu1 %v1024_v2, %s929_s29  ;;  %196 = vrot.lane.b32.xlu0 %v1027_v3, %s929_s29 }
  0x1e   : > { %768 = vmatpush3.bf16.msra.mxu0 %v765_v19  ;;  %796 = vmatpush3.bf16.msra.mxu1 %v765_v19  ;;  %v1239_v19 = vld [vmem:[%s1367_s1] ss:$0 sm:$0xff] }
  0x1f   : > { %770 = vmatprep.subr.bf16.mxu0 %v769_v22  ;;  %789 = vmatprep.subr.bf16.mxu1 %v769_v22 }
  0x21   : > { %220 = vrot.lane.b32.xlu1 %v1027_v3, %s930_s30  ;;  %212 = vrot.lane.b32.xlu0 %v1017_v1, %s930_s30 }
  0x22   : > { %772 = vmatpush3.bf16.msra.mxu0 %v769_v22  ;;  %797 = vmatpush3.bf16.msra.mxu1 %v769_v22 }
  0x23   : > { %774 = vmatprep.subr.bf16.mxu0 %v773_v25  ;;  %790 = vmatprep.subr.bf16.mxu1 %v773_v25 }
  0x25   : > { %222 = vrot.lane.b32.xlu1 %v1024_v2, %s930_s30  ;;  %214 = vrot.lane.b32.xlu0 %v1014_v0, %s930_s30 }
  0x26   : > { %776 = vmatpush3.bf16.msra.mxu0 %v773_v25  ;;  %798 = vmatpush3.bf16.msra.mxu1 %v773_v25 }
  0x27   : > { %778 = vmatprep.subr.bf16.mxu0 %v777_v28  ;;  %791 = vmatprep.subr.bf16.mxu1 %v777_v28 }
  0x29   : > { %244 = vrot.lane.b32.xlu1 %v1027_v3, %s931_s4  ;;  %236 = vrot.lane.b32.xlu0 %v1017_v1, %s931_s4 }
  0x2a   : > { %780 = vmatpush3.bf16.msra.mxu0 %v777_v28  ;;  %799 = vmatpush3.bf16.msra.mxu1 %v777_v28 }
  0x2b   : > { %782 = vmatprep.subr.bf16.mxu0 %v781_v31  ;;  %792 = vmatprep.subr.bf16.mxu1 %v781_v31 }
  0x2d   : > { %246 = vrot.lane.b32.xlu1 %v1024_v2, %s931_s4  ;;  %238 = vrot.lane.b32.xlu0 %v1014_v0, %s931_s4 }
  0x2e   : > { %784 = vmatpush3.bf16.msra.mxu0 %v781_v31  ;;  %800 = vmatpush3.bf16.msra.mxu1 %v781_v31 }
  0x31   : > { %268 = vrot.lane.b32.xlu1 %v1027_v3, %s932_s5  ;;  %260 = vrot.lane.b32.xlu0 %v1017_v1, %s932_s5 }
  0x35   : > { %200 = vrot.lane.b32.xlu1 %v1054_v4, %s929_s29  ;;  %192 = vrot.lane.b32.xlu0 %v1057_v5, %s929_s29 }
  0x39   : > { %270 = vrot.lane.b32.xlu1 %v1024_v2, %s932_s5  ;;  %262 = vrot.lane.b32.xlu0 %v1014_v0, %s932_s5 }
  0x3d   : > { %292 = vrot.lane.b32.xlu1 %v1027_v3, %s933_s6  ;;  %284 = vrot.lane.b32.xlu0 %v1017_v1, %s933_s6 }
  0x41   : > { %202 = vrot.lane.b32.xlu1 %v1072_v6, %s929_s29  ;;  %194 = vrot.lane.b32.xlu0 %v1075_v7, %s929_s29  ;;  %s869_s29 = sshll.u32 %s936_s28, 4  ;;  %s870_s29 = int_to_ptr.vmem [resolvable:$false] %s869_s29 }
  0x45   : > { %224 = vrot.lane.b32.xlu1 %v1054_v4, %s930_s30  ;;  %216 = vrot.lane.b32.xlu0 %v1057_v5, %s930_s30 }
  0x49   : > { %294 = vrot.lane.b32.xlu1 %v1024_v2, %s933_s6  ;;  %286 = vrot.lane.b32.xlu0 %v1014_v0, %s933_s6 }
  0x4d   : > { %316 = vrot.lane.b32.xlu1 %v1027_v3, %s934_s7  ;;  %308 = vrot.lane.b32.xlu0 %v1017_v1, %s934_s7 }
  0x51   : > { %226 = vrot.lane.b32.xlu1 %v1072_v6, %s930_s30  ;;  %218 = vrot.lane.b32.xlu0 %v1075_v7, %s930_s30  ;;  %s871_s30 = scalar_lea.vmem %s870_s29, 2048 }
  0x55   : > { %248 = vrot.lane.b32.xlu1 %v1054_v4, %s931_s4  ;;  %240 = vrot.lane.b32.xlu0 %v1057_v5, %s931_s4 }
  0x59   : > { %318 = vrot.lane.b32.xlu1 %v1024_v2, %s934_s7  ;;  %310 = vrot.lane.b32.xlu0 %v1014_v0, %s934_s7 }
  0x5d   : > { %340 = vrot.lane.b32.xlu1 %v1027_v3, %s935_s10  ;;  %332 = vrot.lane.b32.xlu0 %v1017_v1, %s935_s10 }
  0x61   : > { %250 = vrot.lane.b32.xlu1 %v1072_v6, %s931_s4  ;;  %242 = vrot.lane.b32.xlu0 %v1075_v7, %s931_s4 }
  0x65   : > { %272 = vrot.lane.b32.xlu1 %v1054_v4, %s932_s5  ;;  %264 = vrot.lane.b32.xlu0 %v1057_v5, %s932_s5 }
  0x69   : > { %342 = vrot.lane.b32.xlu1 %v1024_v2, %s935_s10  ;;  %334 = vrot.lane.b32.xlu0 %v1014_v0, %s935_s10 }
  0x6d   : > { %274 = vrot.lane.b32.xlu1 %v1072_v6, %s932_s5  ;;  %266 = vrot.lane.b32.xlu0 %v1075_v7, %s932_s5 }
  0x71   : > { %296 = vrot.lane.b32.xlu1 %v1054_v4, %s933_s6  ;;  %288 = vrot.lane.b32.xlu0 %v1057_v5, %s933_s6 }
  0x75   : > { %298 = vrot.lane.b32.xlu1 %v1072_v6, %s933_s6  ;;  %290 = vrot.lane.b32.xlu0 %v1075_v7, %s933_s6 }
  0x79   : > { %320 = vrot.lane.b32.xlu1 %v1054_v4, %s934_s7  ;;  %312 = vrot.lane.b32.xlu0 %v1057_v5, %s934_s7 }
  0x7d   : > { %322 = vrot.lane.b32.xlu1 %v1072_v6, %s934_s7  ;;  %314 = vrot.lane.b32.xlu0 %v1075_v7, %s934_s7  ;;  %s162_s7 = sand.u32 1, %s919_s13  }
  0x7e   : > { %s1325_s4 = scalar_lea.sflag [#allocation3], %s162_s7 }
  0x81   : > { %344 = vrot.lane.b32.xlu1 %v1054_v4, %s935_s10  ;;  %336 = vrot.lane.b32.xlu0 %v1057_v5, %s935_s10 }
  0x85   : > { %346 = vrot.lane.b32.xlu1 %v1072_v6, %s935_s10  ;;  %338 = vrot.lane.b32.xlu0 %v1075_v7, %s935_s10  ;;  %s675_s10 = sshll.u32 %s162_s7, 6 }
  0x86   : > { %s164_s19 = scalar_lea.vmem [#allocation2], %s675_s10 }
  0x87   : > { %s609_s20 = sshll.u32 %s164_s19, 4  ;;  %s1318_s20 = int_to_ptr.vmem [resolvable:$true] %s609_s20 }
  0x88   : > { %s865_s16 = scalar_lea.vmem %s1318_s20, 1024  ;;  %p872_p0 = scmp.lt.s32.totalorder %s1318_s20, %s870_s29 }
  0x89   : > { %p866_p11 = scmp.ne.s32.totalorder %s1318_s20, %s865_s16  ;;  %p873_p1 = scmp.lt.s32.totalorder %s871_s30, %s865_s16 }
  0x8b   : > { %v191_v32 = vpop.permute.xlu1 %190  ;;  %v189_v33 = vpop.permute.xlu0 %188  ;;  %p867_p12 = pnand %p866_p11, %p997_p5  ;;  %p874_p2 = por %p873_p1, %p872_p0 }
  0x8c   : > { %v358_v38 = vsel %vm356_vm0, %v1014_v0, %v191_v32  ;;  %v357_v9 = vsel %vm356_vm0, %v1017_v1, %v189_v33 }
  0x8d   : > { %p868_p13 = pneg %p867_p12 }
  0x8f   : > { %v1197_v34 = vpop.permute.xlu1 %198  ;;  %v197_v35 = vpop.permute.xlu0 %196  ;;  %p875_p3 = pnand %p874_p2, %p868_p13 }
  0x90   : > { %v361_v10 = vsel %vm356_vm0, %v1027_v3, %v197_v35  ;;  %v362_v35 = vsel %vm356_vm0, %v1024_v2, %v1197_v34 }
  0x93   : > { %v221_v36 = vpop.permute.xlu1 %220  ;;  %v213_v37 = vpop.permute.xlu0 %212 }
  0x94   : > { %v370_v11 = vsel %vm365_vm1, %v361_v10, %v221_v36  ;;  %v366_v12 = vsel %vm365_vm1, %v357_v9, %v213_v37 }
  0x97   : > { %v223_v39 = vpop.permute.xlu1 %222  ;;  %v215_v40 = vpop.permute.xlu0 %214 }
  0x98   : > { %v1202_v41 = vsel %vm365_vm1, %v358_v38, %v215_v40  ;;  %v371_v36 = vsel %vm365_vm1, %v362_v35, %v223_v39 }
  0x9b   : > { %v245_v42 = vpop.permute.xlu1 %244  ;;  %v237_v43 = vpop.permute.xlu0 %236 }
  0x9c   : > { %v379_v15 = vsel %vm374_vm2, %v370_v11, %v245_v42  ;;  %v375_v16 = vsel %vm374_vm2, %v366_v12, %v237_v43 }
  0x9f   : > { %v247_v44 = vpop.permute.xlu1 %246  ;;  %v239_v45 = vpop.permute.xlu0 %238 }
  0xa0   : > { %v380_v43 = vsel %vm374_vm2, %v371_v36, %v247_v44 }
  0xa3   : > { %v269_v46 = vpop.permute.xlu1 %268  ;;  %v261_v47 = vpop.permute.xlu0 %260 }
  0xa4   : > { %v388_v17 = vsel %vm383_vm3, %v379_v15, %v269_v46  ;;  %v384_v1 = vsel %vm383_vm3, %v375_v16, %v261_v47  ;;  %v376_v46 = vsel %vm374_vm2, %v1202_v41, %v239_v45 }
  0xa7   : > { %v1204_v48 = vpop.permute.xlu1 %200  ;;  %v1206_v49 = vpop.permute.xlu0 %192 }
  0xab   : > { %v271_v50 = vpop.permute.xlu1 %270  ;;  %v263_v51 = vpop.permute.xlu0 %262 }
  0xac   : > { %v389_v47 = vsel %vm383_vm3, %v380_v43, %v271_v50 }
  0xaf   : > { %v293_v52 = vpop.permute.xlu1 %292  ;;  %v285_v53 = vpop.permute.xlu0 %284 }
  0xb0   : > { %v397_v3 = vsel %vm392_vm4, %v388_v17, %v293_v52  ;;  %v393_v18 = vsel %vm392_vm4, %v384_v1, %v285_v53  ;;  %v385_v52 = vsel %vm383_vm3, %v376_v46, %v263_v51 }
  0xb3   : > { %v1208_v54 = vpop.permute.xlu1 %202  ;;  %v1210_v55 = vpop.permute.xlu0 %194 }
  0xb7   : > { %v1212_v56 = vpop.permute.xlu1 %224  ;;  %v1214_v57 = vpop.permute.xlu0 %216 }
  0xbb   : > { %v295_v58 = vpop.permute.xlu1 %294  ;;  %v287_v59 = vpop.permute.xlu0 %286 }
  0xbc   : > { %v398_v53 = vsel %vm392_vm4, %v389_v47, %v295_v58  ;;  %v394_v2 = vsel %vm392_vm4, %v385_v52, %v287_v59 }
  0xbf   : > { %v317_v60 = vpop.permute.xlu1 %316  ;;  %v309_v61 = vpop.permute.xlu0 %308 }
  0xc0   : > { %v406_v20 = vsel %vm401_vm5, %v397_v3, %v317_v60  ;;  %v402_v21 = vsel %vm401_vm5, %v393_v18, %v309_v61 }
  0xc3   : > { %v1216_v62 = vpop.permute.xlu1 %226  ;;  %v1218_v63 = vpop.permute.xlu0 %218 }
  0xc7   : > { %v1220_v0 = vpop.permute.xlu1 %248  ;;  %v1222_v8 = vpop.permute.xlu0 %240 }
  0xcb   : > { %v319_v13 = vpop.permute.xlu1 %318  ;;  %v311_v14 = vpop.permute.xlu0 %310 }
  0xcc   : > { %v407_v34 = vsel %vm401_vm5, %v398_v53, %v319_v13  ;;  %v403_v39 = vsel %vm401_vm5, %v394_v2, %v311_v14 }
  0xcf   : > { %v341_v22 = vpop.permute.xlu1 %340  ;;  %v333_v23 = vpop.permute.xlu0 %332 }
  0xd0   : > { %v415_v24 = vsel %vm410_vm6, %v406_v20, %v341_v22  ;;  %v411_v25 = vsel %vm410_vm6, %v402_v21, %v333_v23  ;;  %v363_v21 = vsel %vm356_vm0, %v1054_v4, %v1204_v48  ;;  %v359_v22 = vsel %vm356_vm0, %v1057_v5, %v1206_v49 }
  0xd1   : > { %v430_v26 = vsub.f32 %v415_v24, %v1239_v19  ;;  %v426_v27 = vsub.f32 %v411_v25, %v1239_v19  ;;  %v372_v24 = vsel %vm365_vm1, %v363_v21, %v1212_v56  ;;  %v368_v25 = vsel %vm365_vm1, %v359_v22, %v1214_v57 }
  0xd2   : > { %v377_v4 = vsel %vm374_vm2, %v368_v25, %v1222_v8  ;;  %v364_v49 = vsel %vm356_vm0, %v1072_v6, %v1208_v54  ;;  %v360_v56 = vsel %vm356_vm0, %v1075_v7, %v1210_v55 }
  0xd3   : > { %v438_v28 = vand.u32 2147483647, %v430_v26  ;;  %v434_v29 = vand.u32 2147483647, %v426_v27  ;;  %v1247_v30 = vpop.permute.xlu1 %250  ;;  %v1249_v31 = vpop.permute.xlu0 %242  ;;  %v373_v8 = vsel %vm365_vm1, %v364_v49, %v1216_v62 }
  0xd4   : > { %v382_v54 = vsel %vm374_vm2, %v373_v8, %v1247_v30 }
  0xd5   : > { %v442_v32 = vsub.f32 0.0, %v434_v29  ;;  %v446_v33 = vsub.f32 0.0, %v438_v28  ;;  %v381_v29 = vsel %vm374_vm2, %v372_v24, %v1220_v0 }
  0xd7   : > { %v273_v37 = vpop.permute.xlu1 %272  ;;  %v265_v38 = vpop.permute.xlu0 %264  ;;  %v450_v40 = vmul.f32 1.442695, %v442_v32  ;;  %v458_v42 = vmul.f32 1.442695, %v446_v33  ;;  %v369_v32 = vsel %vm365_vm1, %v360_v56, %v1218_v63 }
  0xd8   : > { %v390_v48 = vsel %vm383_vm3, %v381_v29, %v273_v37  ;;  %v386_v5 = vsel %vm383_vm3, %v377_v4, %v265_v38  ;;  %v378_v7 = vsel %vm374_vm2, %v369_v32, %v1249_v31 }
  0xd9   : > { %849 = vpow2.f32 %v450_v40 }
  0xda   : > { %851 = vpow2.f32 %v458_v42 }
  0xdb   : > { %v343_v60 = vpop.permute.xlu1 %342  ;;  %v335_v61 = vpop.permute.xlu0 %334 }
  0xdc   : > { %v416_v44 = vsel %vm410_vm6, %v407_v34, %v343_v60  ;;  %v412_v41 = vsel %vm410_vm6, %v403_v39, %v335_v61 }
  0xdd   : > { %v431_v45 = vsub.f32 %v416_v44, %v1239_v19  ;;  %v427_v50 = vsub.f32 %v412_v41, %v1239_v19 }
  0xdf   : > { %v439_v51 = vand.u32 2147483647, %v431_v45  ;;  %v435_v9 = vand.u32 2147483647, %v427_v50  ;;  %v275_v58 = vpop.permute.xlu1 %274  ;;  %v267_v10 = vpop.permute.xlu0 %266 }
  0xe0   : > { %v391_v62 = vsel %vm383_vm3, %v382_v54, %v275_v58  ;;  %v387_v63 = vsel %vm383_vm3, %v378_v7, %v267_v10 }
  0xe1   : > { %v447_v59 = vsub.f32 0.0, %v439_v51  ;;  %v443_v11 = vsub.f32 0.0, %v435_v9 }
  0xe3   : > { %v850_v12 = vpop.eup %849  ;;  %v460_v13 = vmul.f32 1.442695, %v447_v59  ;;  %v452_v15 = vmul.f32 1.442695, %v443_v11  ;;  %v297_v14 = vpop.permute.xlu1 %296 }
  0xe4   : > { %v289_v16 = vpop.permute.xlu0 %288  ;;  %v852_v17 = vpop.eup %851  ;;  %741 = vmatprep.mubr.f32.mxu0 %v850_v12  ;;  %v399_v57 = vsel %vm392_vm4, %v390_v48, %v297_v14 }
  0xe5   : > { %853 = vpow2.f32 %v460_v13  ;;  %747 = vmatprep.mubr.f32.mxu1 %v852_v17  ;;  %v395_v0 = vsel %vm392_vm4, %v386_v5, %v289_v16 }
  0xe6   : > { %855 = vpow2.f32 %v452_v15 }
  0xe7   : > { %v299_v1 = vpop.permute.xlu1 %298 }
  0xe8   : > { %v291_v3 = vpop.permute.xlu0 %290  ;;  %v400_v42 = vsel %vm392_vm4, %v391_v62, %v299_v1 }
  0xe9   : > { %v396_v43 = vsel %vm392_vm4, %v387_v63, %v291_v3 }
  0xeb   : > { %v321_v18 = vpop.permute.xlu1 %320 }
  0xec   : > { %v313_v20 = vpop.permute.xlu0 %312  ;;  %v408_v33 = vsel %vm401_vm5, %v399_v57, %v321_v18 }
  0xed   : > { %v404_v35 = vsel %vm401_vm5, %v395_v0, %v313_v20 }
  0xef   : > { %v854_v23 = vpop.eup %853  ;;  %v323_v26 = vpop.permute.xlu1 %322 }
  0xf0   : > { %v315_v27 = vpop.permute.xlu0 %314  ;;  %v856_v28 = vpop.eup %855  ;;  %748 = vmatmul.mubr.f32.vlgmr.msra.gmra.mrb[0].mxu1 %v854_v23  ;;  %v409_v30 = vsel %vm401_vm5, %v400_v42, %v323_v26 }
  0xf1   : > { %742 = vmatmul.mubr.f32.vlgmr.msra.gmra.mrb[0].mxu0 %v856_v28  ;;  %v405_v31 = vsel %vm401_vm5, %v396_v43, %v315_v27 }
  0xf3   : > { %v345_v36 = vpop.permute.xlu1 %344 }
  0xf4   : > { %v337_v6 = vpop.permute.xlu0 %336  ;;  %v417_v55 = vsel %vm410_vm6, %v408_v33, %v345_v36 }
  0xf5   : > { %v413_v37 = vsel %vm410_vm6, %v404_v35, %v337_v6  ;;  %v432_v38 = vsub.f32 %v417_v55, %v1239_v19 }
  0xf6   : > { %v428_v40 = vsub.f32 %v413_v37, %v1239_v19 }
  0xf7   : > { %v440_v46 = vand.u32 2147483647, %v432_v38  ;;  %v347_v52 = vpop.permute.xlu1 %346 }
  0xf8   : > { %v436_v47 = vand.u32 2147483647, %v428_v40  ;;  %v339_v53 = vpop.permute.xlu0 %338  ;;  %v418_v2 = vsel %vm410_vm6, %v409_v30, %v347_v52 }
  0xf9   : > { %v414_v34 = vsel %vm410_vm6, %v405_v31, %v339_v53  ;;  %v448_v39 = vsub.f32 0.0, %v440_v46  ;;  %v433_v61 = vsub.f32 %v418_v2, %v1239_v19 }
  0xfa   : > { %v444_v60 = vsub.f32 0.0, %v436_v47  ;;  %v429_v44 = vsub.f32 %v414_v34, %v1239_v19 }
  0xfb   : > { %v462_v41 = vmul.f32 1.442695, %v448_v39  ;;  %v441_v50 = vand.u32 2147483647, %v433_v61 }
  0xfc   : > { %v454_v45 = vmul.f32 1.442695, %v444_v60  ;;  %v437_v51 = vand.u32 2147483647, %v429_v44 }
  0xfd   : > { %857 = vpow2.f32 %v462_v41  ;;  %v449_v9 = vsub.f32 0.0, %v441_v50 }
  0xfe   : > { %859 = vpow2.f32 %v454_v45  ;;  %v445_v58 = vsub.f32 0.0, %v437_v51 }
  0xff   : > { %v464_v10 = vmul.f32 1.442695, %v449_v9 }
 0x100   : > { %v456_v59 = vmul.f32 1.442695, %v445_v58 }
 0x101   : > { %861 = vpow2.f32 %v464_v10 }
 0x102   : > { %863 = vpow2.f32 %v456_v59 }
 0x107   : > { %v858_v11 = vpop.eup %857 }
 0x108   : > { %v860_v12 = vpop.eup %859  ;;  %750 = vmatprep.mubr.f32.mxu1 %v858_v11 }
 0x109   : > { %744 = vmatprep.mubr.f32.mxu0 %v860_v12 }
 0x10b   : > { %v862_v13 = vpop.eup %861 }
 0x10c   : > { %v864_v19 = vpop.eup %863  ;;  %751 = vmatmul.mubr.f32.gmra.mrb[2].mxu1 %v862_v13 }
 0x10d   : > { %745 = vmatmul.mubr.f32.gmra.mrb[2].mxu0 %v864_v19 }
 0x1c3   : > { %v749_v15 = vpop.f32.mrb[0].mxu1 }
 0x1c4   : > { %v743_v14 = vpop.f32.mrb[0].mxu0  ;;  %592 = vst [vmem:[%s164_s19 + $0x28] sm:$0xff] %v749_v15  ;;  %v568_v16 = vpop.f32.mrb[1].mxu1 }
 0x1c5   : > { %588 = vst [vmem:[%s164_s19 + $0x8] sm:$0xff] %v743_v14  ;;  %v548_v17 = vpop.f32.mrb[1].mxu0  ;;  %591 = vst [vmem:[%s164_s19 + $0x20] sm:$0xff] %v568_v16 }
 0x1c6   : > { %587 = vst [vmem:[%s164_s19] sm:$0xff] %v548_v17 }
 0x1df   : > { %v752_v1 = vpop.f32.mrb[2].mxu1 }
 0x1e0   : > { %v746_v3 = vpop.f32.mrb[2].mxu0  ;;  %594 = vst [vmem:[%s164_s19 + $0x38] sm:$0xff] %v752_v1  ;;  %v578_v18 = vpop.f32.mrb[3].mxu1 }
 0x1e1   : > { %590 = vst [vmem:[%s164_s19 + $0x18] sm:$0xff] %v746_v3  ;;  %v558_v20 = vpop.f32.mrb[3].mxu0  ;;  %593 = vst [vmem:[%s164_s19 + $0x30] sm:$0xff] %v578_v18 }
 0x1e2   : > { %589 = vst [vmem:[%s164_s19 + $0x10] sm:$0xff] %v558_v20 }
 0x1e3   : > { %878 = shalt.err (!%p875_p3)
}
 0x1e4   : > { %s879_s8 = scalar_lea.hbm %s1323_s27, 1024  ;;  %s883_s17 = scalar_lea.hbm %s1369_s3, 2048 }
 0x1e5   : > { %p880_p4 = scmp.ne.s32.totalorder %s1323_s27, %s879_s8  ;;  %p884_p9 = scmp.lt.u32.totalorder %s1323_s27, %s1369_s3 }
 0x1e6   : > { %p885_p10 = scmp.lt.u32.totalorder %s883_s17, %s879_s8  ;;  %p887_p12 = scmp.lt.u32.totalorder %s879_s8, %s1323_s27 }
 0x1e7   : > { %p881_p7 = pnand %p880_p4, %p997_p5 }
 0x1e8   : > { %p886_p11 = por %p885_p10, %p884_p9 }
 0x1e9   : > { %p882_p8 = pneg %p881_p7 }
 0x1ea   : > { %p888_p13 = por %p887_p12, %p886_p11 }
 0x1ec   : > { %p889_p0 = pnand %p888_p13, %p882_p8 }
 0x1ee   : > { %892 = shalt.err (!%p889_p0)
}
 0x1ef   : > { %s937_s7 = smov 128   ;;  %s938_s10 = smov 8  }
 0x1f0   : > { %801 = dma.vmem_to_hbm [thread:$0]  (%p997_p5), %s1318_s20, 1024, %s1323_s27, %s1325_s4, %s937_s7, %s937_s7, %s938_s10  }
 0x1f1 PF: > { %p807_p1 = scmp.ge.s32.totalorder %s927_s15, 2  ;;  %s624_s19 = sand.u32 1, %s915_s12  }
 0x1f2   : > { %s625_s24 = scalar_lea.sflag [#allocation3], %s624_s19 }
 0x1f3   : > { %p804_p2 = pnand %p807_p1, %p1001_p6 }
 0x1f5   : > { %910 = dma.done.wait (!%p804_p2), %s625_s24, 1024  }
 0x1f6   : > { %912 = vsyncadd (!%p804_p2), %s625_s24, 4294966272  ;;  %p13_p3 = scmp.ge.s32.totalorder %s984_s18, 4   ;;  %s1372_s12 = smov %s919_s13 }
 0x1f7   : > { %s1373_s13 = smov %s923_s14  ;;  %s1374_s14 = smov %s995_s21 }
 0x1f8   : > { %s1375_s15 = smov %s984_s18  ;;  %15 = sbr.rel (!%p13_p3) target bundleno = 3 (0x3), region = 67 }
 0x1ff   :  { %630 = vsyncpa [#allocation3], 1 }
 0x200   :  { %632 = vsyncpa [#allocation3 + $0x1], 1 }

</bundles_post_ra>
